<compile_context>
chip_gen: v6e
topology: v6e:2x2x1
jax: 0.10.0
libtpu: 0.0.40
codegen_flags: <defaults>
</compile_context>

<pallas_src>
import functools

import jax
import jax.numpy as jnp
from jax.experimental import pallas as pl
from jax.experimental.pallas import tpu as pltpu


# ----------------------------------------------------------------------------
# Kernel 1: per-layer transform (single program, whole arrays in VMEM).
# ----------------------------------------------------------------------------
def gat_transform_kernel(x_ref, w_ref, asrcT_ref, adstT_ref,
                         hblk_ref, ssrcT_ref, sdst_ref, *, heads, f_out, n):
    hf = heads * f_out
    x = x_ref[...].astype(jnp.bfloat16)
    w = w_ref[...].astype(jnp.bfloat16)
    h = jnp.dot(x, w, preferred_element_type=jnp.float32)          # (N, hf) f32

    dn = (((1,), (1,)), ((), ()))                                   # contract feat axes
    # s_srcT[h, j] = sum_f a_src_blk[h, f] * h[j, f]   -> (heads, N), lane-dense
    ssrcT_ref[...] = jax.lax.dot_general(asrcT_ref[...], h, dn,
                                         preferred_element_type=jnp.float32)
    # s_dst[i, h]  = sum_f h[i, f] * a_dst_blk[h, f]   -> (N, heads)
    sdst_ref[...] = jax.lax.dot_general(h, adstT_ref[...], dn,
                                        preferred_element_type=jnp.float32)

    # Block-diagonal source features: rows [h*N, (h+1)*N) keep only head h's
    # lane block, so attention @ hblk lands pre-concatenated across heads.
    hb = h.astype(jnp.bfloat16)
    col = jax.lax.broadcasted_iota(jnp.int32, (1, hf), 1)
    for hd in range(heads):                                         # static unroll
        keep = ((col >= hd * f_out) & (col < (hd + 1) * f_out)).astype(jnp.bfloat16)
        hblk_ref[pl.ds(hd * n, n), :] = hb * keep


def gat_transform(x, w, a_src_blkT, a_dst_blkT, *, heads, f_out):
    n = x.shape[0]
    hf = heads * f_out
    kernel = functools.partial(gat_transform_kernel, heads=heads, f_out=f_out, n=n)
    # Grid-less call; every operand is O(N * hf) and tiny at these sizes.
    # TODO(synk): for very large graphs, tile this transform over source rows.
    return pl.pallas_call(
        kernel,
        out_shape=(jax.ShapeDtypeStruct((heads * n, hf), jnp.bfloat16),   # hblk
                   jax.ShapeDtypeStruct((heads, n), jnp.float32),         # s_src^T
                   jax.ShapeDtypeStruct((n, heads), jnp.float32)),        # s_dst
    )(x, w, a_src_blkT, a_dst_blkT)


# ----------------------------------------------------------------------------
# Kernel 2: attention + aggregation + fused epilogue, per destination-row tile.
# ----------------------------------------------------------------------------
def gat_attention_kernel(adj_ref, sdst_ref, ssrcT_ref, hblk_ref, b_ref,
                         scale_ref, shift_ref, o_ref, *,
                         heads, f_out, n, apply_elu, apply_log_softmax):
    hf = heads * f_out
    tm = o_ref.shape[0]
    neigh = adj_ref[...] != 0                      # (TM, N), reused by all heads
    sd = sdst_ref[...]                             # (TM, heads) dst scores
    ss = ssrcT_ref[...]                            # (heads, N)  src scores
    neg = jnp.float32(-1e30)

    # Head-paired aggregation: LHS [p_{2k} | p_{2k+1}] (TM, 2N) x block-diagonal
    # RHS (2N, hf) feeds K = 2N of contraction per MXU pass and accumulates
    # directly into the lane-dense (TM, hf) result (no 16-lane concats).
    # TODO(synk): for large N / TM >= 256, convert the pair loop to
    # lax.fori_loop to bound live ranges, and add a source-column grid axis with
    # online-softmax accumulation instead of holding all N sources resident.
    group = 2 if heads % 2 == 0 else 1
    acc = jnp.zeros((tm, hf), jnp.float32)
    for g0 in range(0, heads, group):
        probs = []
        for hd in range(g0, g0 + group):
            e = sd[:, hd:hd + 1] + ss[hd:hd + 1, :]           # (TM, N)
            e = jnp.where(e > 0, e, 0.2 * e)                  # LeakyReLU(0.2)
            e = jnp.where(neigh, e, neg)                      # mask non-edges
            m = jnp.max(e, axis=1, keepdims=True)             # finite: self-loops
            p = jnp.exp(e - m)
            denom = jnp.sum(p, axis=1, keepdims=True)         # >= 1
            p = p * pl.reciprocal(denom, approx=True)         # softmax (EUP vrcp)
            probs.append(p.astype(jnp.bfloat16))
        lhs = probs[0] if group == 1 else jnp.concatenate(probs, axis=1)
        rhs = hblk_ref[pl.ds(g0 * n, group * n), :]           # (group*N, hf) bf16
        acc = acc + jnp.dot(lhs, rhs, preferred_element_type=jnp.float32)

    out = acc + b_ref[...]                                    # GATConv bias
    if apply_elu:
        # clamp arg so exp never produces inf in the unselected branch
        out = jnp.where(out > 0, out, jnp.exp(jnp.minimum(out, 0.0)) - 1.0)
    out = out * scale_ref[...] + shift_ref[...]               # fused eval BatchNorm
    if apply_log_softmax:
        mx = jnp.max(out, axis=1, keepdims=True)
        z = out - mx
        out = z - jnp.log(jnp.sum(jnp.exp(z), axis=1, keepdims=True))
    o_ref[...] = out.astype(o_ref.dtype)                      # one lane-dense store


def _choose_tm(n):
    # Largest destination-row tile dividing N, capped at 256 (v7x has 64 MiB VMEM).
    for cand in (256, 128, 64, 32, 16, 8):
        if n % cand == 0:
            return cand
    return n


def _attn_vmem_limit_bytes(tm, n, heads, hf):
    lane = lambda c: -(-c // 128) * 128
    sub = lambda r: -(-r // 8) * 8
    need = (2 * tm * lane(n)                      # int8 adjacency row tile (x2 buf)
            + 2 * tm * 128 * 4                    # dst-score tile (lane-padded, x2)
            + 2 * sub(heads) * lane(n) * 4        # src scores (constant, x2)
            + 2 * heads * n * lane(hf) * 2        # block-diag features (constant, x2)
            + 2 * 3 * 8 * lane(hf) * 4            # bias / scale / shift
            + 2 * tm * lane(hf) * 4               # output tile (x2)
            + 10 * tm * lane(n) * 4               # e / p / mask temporaries
            + 4 * tm * lane(hf) * 4)              # accumulator / epilogue temps
    # Floor at 32 MiB (>= every generation's scoped default), cap at v7x's 64 MiB.
    return int(min(max(2 * need, 32 * 1024 * 1024), 64 * 1024 * 1024))


def gat_attention(adj_i8, sdst, ssrcT, hblk, bias, bn_scale, bn_shift, *,
                  heads, f_out, apply_elu, apply_log_softmax, out_dtype, tm):
    n = adj_i8.shape[0]
    hf = heads * f_out
    assert n % tm == 0, "destination-row tile must divide num_nodes"
    kernel = functools.partial(
        gat_attention_kernel, heads=heads, f_out=f_out, n=n,
        apply_elu=apply_elu, apply_log_softmax=apply_log_softmax)
    const = lambda i: (0, 0)
    # TODO(synk): for very large N, set pipeline_mode=pl.Buffered(1) on the
    # constant-index inputs (ssrcT/hblk/bias/scale/shift) to reclaim their second
    # buffer, and pack the adjacency as a bitmask (8 edges/byte) to cut the N^2
    # HBM stream.
    return pl.pallas_call(
        kernel,
        out_shape=jax.ShapeDtypeStruct((n, hf), out_dtype),
        grid=(n // tm,),
        in_specs=[
            pl.BlockSpec((tm, n), lambda i: (i, 0)),       # adjacency row tile (streamed)
            pl.BlockSpec((tm, heads), lambda i: (i, 0)),   # dst scores
            pl.BlockSpec((heads, n), const),               # src scores (lane-dense)
            pl.BlockSpec((heads * n, hf), const),          # block-diag source features
            pl.BlockSpec((1, hf), const),                  # bias
            pl.BlockSpec((1, hf), const),                  # BN scale
            pl.BlockSpec((1, hf), const),                  # BN shift
        ],
        out_specs=pl.BlockSpec((tm, hf), lambda i: (i, 0)),
        compiler_params=pltpu.CompilerParams(
            dimension_semantics=("parallel",),             # tiles independent -> v7x megacore
            vmem_limit_bytes=_attn_vmem_limit_bytes(tm, n, heads, hf)),
    )(adj_i8, sdst, ssrcT, hblk, bias, bn_scale, bn_shift)


# ----------------------------------------------------------------------------
# Host-side parameter preparation (one time).
# ----------------------------------------------------------------------------
def block_diag_att_T(a):
    """(H, F) attention vector -> (H, H*F) block-diagonal (transposed) matrix."""
    h, f = a.shape
    eye = jnp.eye(h, dtype=a.dtype)
    return (eye[:, :, None] * a[None, :, :]).reshape(h, h * f)


def bn_fold(gamma, beta, mean, var, eps=1e-5):
    """Eval-mode BatchNorm1d -> (scale, shift) row vectors."""
    scale = gamma / jnp.sqrt(var + eps)
    shift = beta - mean * scale
    return scale.reshape(1, -1), shift.reshape(1, -1)


def gat_layer(x, adj_i8, w, a_src, a_dst, bias, bn_scale, bn_shift, *,
              heads, f_out, apply_elu, apply_log_softmax, out_dtype, tm):
    hblk, ssrcT, sdst = gat_transform(
        x, w, block_diag_att_T(a_src), block_diag_att_T(a_dst),
        heads=heads, f_out=f_out)
    return gat_attention(
        adj_i8, sdst, ssrcT, hblk, bias.reshape(1, -1), bn_scale, bn_shift,
        heads=heads, f_out=f_out, apply_elu=apply_elu,
        apply_log_softmax=apply_log_softmax, out_dtype=out_dtype, tm=tm)


# ----------------------------------------------------------------------------
# Full GAT forward.
# ----------------------------------------------------------------------------
def gat_forward(params, x, adj_i8, *, tm=None):
    heads = params["heads"]
    hid = params["hidden_dim"]
    nc = params["num_classes"]
    hf = heads * hid
    n = x.shape[0]
    if tm is None:
        tm = _choose_tm(n)

    s1, t1 = bn_fold(params["bn1_g"], params["bn1_b"],
                     params["bn1_m"], params["bn1_v"])
    s2, t2 = bn_fold(params["bn2_g"], params["bn2_b"],
                     params["bn2_m"], params["bn2_v"])

    # conv1 -> ELU -> BN1 (fused); bf16 inter-layer activations.
    h = gat_layer(x, adj_i8, params["w1"], params["a_src1"], params["a_dst1"],
                  params["b1"], s1, t1, heads=heads, f_out=hid,
                  apply_elu=True, apply_log_softmax=False,
                  out_dtype=jnp.bfloat16, tm=tm)
    # conv2 -> ELU -> BN2
    h = gat_layer(h, adj_i8, params["w2"], params["a_src2"], params["a_dst2"],
                  params["b2"], s2, t2, heads=heads, f_out=hid,
                  apply_elu=True, apply_log_softmax=False,
                  out_dtype=jnp.bfloat16, tm=tm)

    # conv3 (single head) -> log_softmax, classes padded to a lane-dense width.
    # Padded weight/attention columns are zero (their aggregation is exactly 0)
    # and the padded bias is -1e30, so log_softmax over the padded row equals
    # log_softmax over the real classes; the wrapper slices the pad off.
    ncp = max(128, -(-nc // 128) * 128)
    w3p = jnp.zeros((hf, ncp), jnp.float32).at[:, :nc].set(params["w3"])
    a_src3p = jnp.zeros((1, ncp), jnp.float32).at[:, :nc].set(params["a_src3"])
    a_dst3p = jnp.zeros((1, ncp), jnp.float32).at[:, :nc].set(params["a_dst3"])
    b3p = jnp.full((ncp,), -1e30, jnp.float32).at[:nc].set(params["b3"])
    s3 = jnp.ones((1, ncp), jnp.float32)
    t3 = jnp.zeros((1, ncp), jnp.float32)
    out = gat_layer(h, adj_i8, w3p, a_src3p, a_dst3p, b3p, s3, t3,
                    heads=1, f_out=ncp, apply_elu=False, apply_log_softmax=True,
                    out_dtype=jnp.float32, tm=tm)
    return out[:, :nc]


# ----------------------------------------------------------------------------
# Deterministic parameter / input construction.
# ----------------------------------------------------------------------------
def make_params(key, num_features, num_classes, hidden_dim=16, heads=8):
    ks = jax.random.split(key, 12)
    scale = 0.1
    d1 = hidden_dim * heads
    return {
        "hidden_dim": hidden_dim, "heads": heads, "num_classes": num_classes,
        # conv1
        "w1": scale * jax.random.normal(ks[0], (num_features, d1), jnp.float32),
        "a_src1": scale * jax.random.normal(ks[1], (heads, hidden_dim), jnp.float32),
        "a_dst1": scale * jax.random.normal(ks[2], (heads, hidden_dim), jnp.float32),
        "b1": jnp.zeros((d1,), jnp.float32),
        # conv2
        "w2": scale * jax.random.normal(ks[3], (d1, d1), jnp.float32),
        "a_src2": scale * jax.random.normal(ks[4], (heads, hidden_dim), jnp.float32),
        "a_dst2": scale * jax.random.normal(ks[5], (heads, hidden_dim), jnp.float32),
        "b2": jnp.zeros((d1,), jnp.float32),
        # conv3 (heads=1, concat)
        "w3": scale * jax.random.normal(ks[6], (d1, num_classes), jnp.float32),
        "a_src3": scale * jax.random.normal(ks[7], (1, num_classes), jnp.float32),
        "a_dst3": scale * jax.random.normal(ks[8], (1, num_classes), jnp.float32),
        "b3": jnp.zeros((num_classes,), jnp.float32),
        # BatchNorm1d defaults (eval mode)
        "bn1_g": jnp.ones((d1,), jnp.float32), "bn1_b": jnp.zeros((d1,), jnp.float32),
        "bn1_m": jnp.zeros((d1,), jnp.float32), "bn1_v": jnp.ones((d1,), jnp.float32),
        "bn2_g": jnp.ones((d1,), jnp.float32), "bn2_b": jnp.zeros((d1,), jnp.float32),
        "bn2_m": jnp.zeros((d1,), jnp.float32), "bn2_v": jnp.ones((d1,), jnp.float32),
    }


def build_dense_adj(edge_index, num_nodes):
    """int8 dense mask: adj[i, j] = 1 if edge j -> i; self-loops added."""
    src, dst = edge_index[0], edge_index[1]
    adj = jnp.zeros((num_nodes, num_nodes), jnp.int8).at[dst, src].set(1)
    diag = jnp.arange(num_nodes)
    adj = adj.at[diag, diag].set(1)
    return adj


if __name__ == "__main__":
    key = jax.random.PRNGKey(0)
    k_x, k_e, k_p = jax.random.split(key, 3)

    num_nodes = 128
    num_features = 64
    num_classes = 8
    num_edges = 512

    x = jax.random.normal(k_x, (num_nodes, num_features), jnp.float32)
    edge_index = jax.random.randint(k_e, (2, num_edges), 0, num_nodes)
    adj = build_dense_adj(edge_index, num_nodes)           # int8 (128, 128)

    params = make_params(k_p, num_features, num_classes)

    # Default tm = 128 for N = 128 (single lane-dense destination tile per layer).
    out = gat_forward(params, x, adj)                      # (N, C) log-probs
    out = jax.block_until_ready(out)

    assert out.shape == (num_nodes, num_classes)
    assert bool(jnp.all(jnp.isfinite(out)))
    # rows of log_softmax must sum (in prob space) to 1
    assert bool(jnp.allclose(jnp.sum(jnp.exp(out), axis=1), 1.0, atol=1e-4))

    print("KERNEL_OK")
</pallas_src>

<mosaic_0001>
module attributes {stable_mosaic.version = 11 : i64} {
  func.func @gat_transform_kernel(%arg0: memref<128x64xf32, #tpu.memory_space<vmem>>, %arg1: memref<64x128xf32, #tpu.memory_space<vmem>>, %arg2: memref<8x128xf32, #tpu.memory_space<vmem>>, %arg3: memref<8x128xf32, #tpu.memory_space<vmem>>, %arg4: memref<1024x128xbf16, #tpu.memory_space<vmem>>, %arg5: memref<8x128xf32, #tpu.memory_space<vmem>>, %arg6: memref<128x8xf32, #tpu.memory_space<vmem>>) attributes {dimension_semantics = [], scalar_prefetch = 0 : i64, scratch_operands = 0 : i64, tpu.core_type = #tpu.core_type<tc>} {
    %c0 = arith.constant 0 : index
    %c0_0 = arith.constant 0 : index
    %0 = vector.load %arg0[%c0, %c0_0] : memref<128x64xf32, #tpu.memory_space<vmem>>, vector<128x64xf32>
    %1 = arith.truncf %0 : vector<128x64xf32> to vector<128x64xbf16>
    %c0_1 = arith.constant 0 : index
    %c0_2 = arith.constant 0 : index
    %2 = vector.load %arg1[%c0_1, %c0_2] : memref<64x128xf32, #tpu.memory_space<vmem>>, vector<64x128xf32>
    %3 = arith.truncf %2 : vector<64x128xf32> to vector<64x128xbf16>
    %cst = arith.constant dense<0.000000e+00> : vector<128x128xf32>
    %4 = tpu.matmul %1, %3, %cst {dimension_numbers = #tpu.dot_dimension_numbers<[1], [0], [0], [1], [0, 0, 1, 1], [], []>} : vector<128x64xbf16>, vector<64x128xbf16>, vector<128x128xf32> -> vector<128x128xf32>
    %c0_3 = arith.constant 0 : index
    %c0_4 = arith.constant 0 : index
    %5 = vector.load %arg2[%c0_3, %c0_4] : memref<8x128xf32, #tpu.memory_space<vmem>>, vector<8x128xf32>
    %cst_5 = arith.constant dense<0.000000e+00> : vector<8x128xf32>
    %6 = tpu.matmul %5, %4, %cst_5 {dimension_numbers = #tpu.dot_dimension_numbers<[1], [1], [0], [0], [0, 0, 1, 0], [], []>} : vector<8x128xf32>, vector<128x128xf32>, vector<8x128xf32> -> vector<8x128xf32>
    %c0_6 = arith.constant 0 : index
    %c0_7 = arith.constant 0 : index
    %7 = vector.load %arg5[%c0_6, %c0_7] : memref<8x128xf32, #tpu.memory_space<vmem>>, vector<8x128xf32>
    tpu.vector_store %arg5[%c0_6, %c0_7], %6 {strides = array<i32>} : memref<8x128xf32, #tpu.memory_space<vmem>>, vector<8x128xf32>,
    %c0_8 = arith.constant 0 : index
    %c0_9 = arith.constant 0 : index
    %8 = vector.load %arg3[%c0_8, %c0_9] : memref<8x128xf32, #tpu.memory_space<vmem>>, vector<8x128xf32>
    %cst_10 = arith.constant dense<0.000000e+00> : vector<128x8xf32>
    %9 = tpu.matmul %4, %8, %cst_10 {dimension_numbers = #tpu.dot_dimension_numbers<[1], [1], [0], [0], [0, 0, 1, 0], [], []>} : vector<128x128xf32>, vector<8x128xf32>, vector<128x8xf32> -> vector<128x8xf32>
    %c0_11 = arith.constant 0 : index
    %c0_12 = arith.constant 0 : index
    %10 = vector.load %arg6[%c0_11, %c0_12] : memref<128x8xf32, #tpu.memory_space<vmem>>, vector<128x8xf32>
    tpu.vector_store %arg6[%c0_11, %c0_12], %9 {strides = array<i32>} : memref<128x8xf32, #tpu.memory_space<vmem>>, vector<128x8xf32>,
    %11 = arith.truncf %4 : vector<128x128xf32> to vector<128x128xbf16>
    %12 = tpu.iota {dimensions = array<i32: 1>} : vector<1x128xi32>
    %c0_i32 = arith.constant 0 : i32
    %13 = vector.broadcast %c0_i32 : i32 to vector<1x128xi32>
    %14 = arith.cmpi sge, %12, %13 : vector<1x128xi32>
    %c16_i32 = arith.constant 16 : i32
    %15 = vector.broadcast %c16_i32 : i32 to vector<1x128xi32>
    %16 = arith.cmpi slt, %12, %15 : vector<1x128xi32>
    %17 = arith.andi %14, %16 : vector<1x128xi1>
    %18 = arith.extui %17 : vector<1x128xi1> to vector<1x128xi32>
    %19 = arith.sitofp %18 : vector<1x128xi32> to vector<1x128xf32>
    %20 = arith.truncf %19 : vector<1x128xf32> to vector<1x128xbf16>
    %21 = vector.broadcast %20 : vector<1x128xbf16> to vector<128x128xbf16>
    %22 = arith.mulf %11, %21 : vector<128x128xbf16>
    %c0_13 = arith.constant 0 : index
    %c0_14 = arith.constant 0 : index
    %23 = vector.load %arg4[%c0_13, %c0_14] : memref<1024x128xbf16, #tpu.memory_space<vmem>>, vector<128x128xbf16>
    tpu.vector_store %arg4[%c0_13, %c0_14], %22 {strides = array<i32>} : memref<1024x128xbf16, #tpu.memory_space<vmem>>, vector<128x128xbf16>,
    %c16_i32_15 = arith.constant 16 : i32
    %24 = vector.broadcast %c16_i32_15 : i32 to vector<1x128xi32>
    %25 = arith.cmpi sge, %12, %24 : vector<1x128xi32>
    %c32_i32 = arith.constant 32 : i32
    %26 = vector.broadcast %c32_i32 : i32 to vector<1x128xi32>
    %27 = arith.cmpi slt, %12, %26 : vector<1x128xi32>
    %28 = arith.andi %25, %27 : vector<1x128xi1>
    %29 = arith.extui %28 : vector<1x128xi1> to vector<1x128xi32>
    %30 = arith.sitofp %29 : vector<1x128xi32> to vector<1x128xf32>
    %31 = arith.truncf %30 : vector<1x128xf32> to vector<1x128xbf16>
    %32 = vector.broadcast %31 : vector<1x128xbf16> to vector<128x128xbf16>
    %33 = arith.mulf %11, %32 : vector<128x128xbf16>
    %c128 = arith.constant 128 : index
    %c0_16 = arith.constant 0 : index
    %34 = vector.load %arg4[%c128, %c0_16] : memref<1024x128xbf16, #tpu.memory_space<vmem>>, vector<128x128xbf16>
    tpu.vector_store %arg4[%c128, %c0_16], %33 {strides = array<i32>} : memref<1024x128xbf16, #tpu.memory_space<vmem>>, vector<128x128xbf16>,
    %c32_i32_17 = arith.constant 32 : i32
    %35 = vector.broadcast %c32_i32_17 : i32 to vector<1x128xi32>
    %36 = arith.cmpi sge, %12, %35 : vector<1x128xi32>
    %c48_i32 = arith.constant 48 : i32
    %37 = vector.broadcast %c48_i32 : i32 to vector<1x128xi32>
    %38 = arith.cmpi slt, %12, %37 : vector<1x128xi32>
    %39 = arith.andi %36, %38 : vector<1x128xi1>
    %40 = arith.extui %39 : vector<1x128xi1> to vector<1x128xi32>
    %41 = arith.sitofp %40 : vector<1x128xi32> to vector<1x128xf32>
    %42 = arith.truncf %41 : vector<1x128xf32> to vector<1x128xbf16>
    %43 = vector.broadcast %42 : vector<1x128xbf16> to vector<128x128xbf16>
    %44 = arith.mulf %11, %43 : vector<128x128xbf16>
    %c256 = arith.constant 256 : index
    %c0_18 = arith.constant 0 : index
    %45 = vector.load %arg4[%c256, %c0_18] : memref<1024x128xbf16, #tpu.memory_space<vmem>>, vector<128x128xbf16>
    tpu.vector_store %arg4[%c256, %c0_18], %44 {strides = array<i32>} : memref<1024x128xbf16, #tpu.memory_space<vmem>>, vector<128x128xbf16>,
    %c48_i32_19 = arith.constant 48 : i32
    %46 = vector.broadcast %c48_i32_19 : i32 to vector<1x128xi32>
    %47 = arith.cmpi sge, %12, %46 : vector<1x128xi32>
    %c64_i32 = arith.constant 64 : i32
    %48 = vector.broadcast %c64_i32 : i32 to vector<1x128xi32>
    %49 = arith.cmpi slt, %12, %48 : vector<1x128xi32>
    %50 = arith.andi %47, %49 : vector<1x128xi1>
    %51 = arith.extui %50 : vector<1x128xi1> to vector<1x128xi32>
    %52 = arith.sitofp %51 : vector<1x128xi32> to vector<1x128xf32>
    %53 = arith.truncf %52 : vector<1x128xf32> to vector<1x128xbf16>
    %54 = vector.broadcast %53 : vector<1x128xbf16> to vector<128x128xbf16>
    %55 = arith.mulf %11, %54 : vector<128x128xbf16>
    %c384 = arith.constant 384 : index
    %c0_20 = arith.constant 0 : index
    %56 = vector.load %arg4[%c384, %c0_20] : memref<1024x128xbf16, #tpu.memory_space<vmem>>, vector<128x128xbf16>
    tpu.vector_store %arg4[%c384, %c0_20], %55 {strides = array<i32>} : memref<1024x128xbf16, #tpu.memory_space<vmem>>, vector<128x128xbf16>,
    %c64_i32_21 = arith.constant 64 : i32
    %57 = vector.broadcast %c64_i32_21 : i32 to vector<1x128xi32>
    %58 = arith.cmpi sge, %12, %57 : vector<1x128xi32>
    %c80_i32 = arith.constant 80 : i32
    %59 = vector.broadcast %c80_i32 : i32 to vector<1x128xi32>
    %60 = arith.cmpi slt, %12, %59 : vector<1x128xi32>
    %61 = arith.andi %58, %60 : vector<1x128xi1>
    %62 = arith.extui %61 : vector<1x128xi1> to vector<1x128xi32>
    %63 = arith.sitofp %62 : vector<1x128xi32> to vector<1x128xf32>
    %64 = arith.truncf %63 : vector<1x128xf32> to vector<1x128xbf16>
    %65 = vector.broadcast %64 : vector<1x128xbf16> to vector<128x128xbf16>
    %66 = arith.mulf %11, %65 : vector<128x128xbf16>
    %c512 = arith.constant 512 : index
    %c0_22 = arith.constant 0 : index
    %67 = vector.load %arg4[%c512, %c0_22] : memref<1024x128xbf16, #tpu.memory_space<vmem>>, vector<128x128xbf16>
    tpu.vector_store %arg4[%c512, %c0_22], %66 {strides = array<i32>} : memref<1024x128xbf16, #tpu.memory_space<vmem>>, vector<128x128xbf16>,
    %c80_i32_23 = arith.constant 80 : i32
    %68 = vector.broadcast %c80_i32_23 : i32 to vector<1x128xi32>
    %69 = arith.cmpi sge, %12, %68 : vector<1x128xi32>
    %c96_i32 = arith.constant 96 : i32
    %70 = vector.broadcast %c96_i32 : i32 to vector<1x128xi32>
    %71 = arith.cmpi slt, %12, %70 : vector<1x128xi32>
    %72 = arith.andi %69, %71 : vector<1x128xi1>
    %73 = arith.extui %72 : vector<1x128xi1> to vector<1x128xi32>
    %74 = arith.sitofp %73 : vector<1x128xi32> to vector<1x128xf32>
    %75 = arith.truncf %74 : vector<1x128xf32> to vector<1x128xbf16>
    %76 = vector.broadcast %75 : vector<1x128xbf16> to vector<128x128xbf16>
    %77 = arith.mulf %11, %76 : vector<128x128xbf16>
    %c640 = arith.constant 640 : index
    %c0_24 = arith.constant 0 : index
    %78 = vector.load %arg4[%c640, %c0_24] : memref<1024x128xbf16, #tpu.memory_space<vmem>>, vector<128x128xbf16>
    tpu.vector_store %arg4[%c640, %c0_24], %77 {strides = array<i32>} : memref<1024x128xbf16, #tpu.memory_space<vmem>>, vector<128x128xbf16>,
    %c96_i32_25 = arith.constant 96 : i32
    %79 = vector.broadcast %c96_i32_25 : i32 to vector<1x128xi32>
    %80 = arith.cmpi sge, %12, %79 : vector<1x128xi32>
    %c112_i32 = arith.constant 112 : i32
    %81 = vector.broadcast %c112_i32 : i32 to vector<1x128xi32>
    %82 = arith.cmpi slt, %12, %81 : vector<1x128xi32>
    %83 = arith.andi %80, %82 : vector<1x128xi1>
    %84 = arith.extui %83 : vector<1x128xi1> to vector<1x128xi32>
    %85 = arith.sitofp %84 : vector<1x128xi32> to vector<1x128xf32>
    %86 = arith.truncf %85 : vector<1x128xf32> to vector<1x128xbf16>
    %87 = vector.broadcast %86 : vector<1x128xbf16> to vector<128x128xbf16>
    %88 = arith.mulf %11, %87 : vector<128x128xbf16>
    %c768 = arith.constant 768 : index
    %c0_26 = arith.constant 0 : index
    %89 = vector.load %arg4[%c768, %c0_26] : memref<1024x128xbf16, #tpu.memory_space<vmem>>, vector<128x128xbf16>
    tpu.vector_store %arg4[%c768, %c0_26], %88 {strides = array<i32>} : memref<1024x128xbf16, #tpu.memory_space<vmem>>, vector<128x128xbf16>,
    %c112_i32_27 = arith.constant 112 : i32
    %90 = vector.broadcast %c112_i32_27 : i32 to vector<1x128xi32>
    %91 = arith.cmpi sge, %12, %90 : vector<1x128xi32>
    %c128_i32 = arith.constant 128 : i32
    %92 = vector.broadcast %c128_i32 : i32 to vector<1x128xi32>
    %93 = arith.cmpi slt, %12, %92 : vector<1x128xi32>
    %94 = arith.andi %91, %93 : vector<1x128xi1>
    %95 = arith.extui %94 : vector<1x128xi1> to vector<1x128xi32>
    %96 = arith.sitofp %95 : vector<1x128xi32> to vector<1x128xf32>
    %97 = arith.truncf %96 : vector<1x128xf32> to vector<1x128xbf16>
    %98 = vector.broadcast %97 : vector<1x128xbf16> to vector<128x128xbf16>
    %99 = arith.mulf %11, %98 : vector<128x128xbf16>
    %c896 = arith.constant 896 : index
    %c0_28 = arith.constant 0 : index
    %100 = vector.load %arg4[%c896, %c0_28] : memref<1024x128xbf16, #tpu.memory_space<vmem>>, vector<128x128xbf16>
    tpu.vector_store %arg4[%c896, %c0_28], %99 {strides = array<i32>} : memref<1024x128xbf16, #tpu.memory_space<vmem>>, vector<128x128xbf16>,
    return
  }
}

</mosaic_0001>

<bundles_post_ra>
// kernel: tpu_custom_call.1
= control target key start
LH: loop header
LB: loop body
LE: loop exit
PB: predicated region body
PF: predicated region fallthrough
CT: control target
= control target key end

     0   :  { %12 = vsyncpa [#allocation3], 0  ;;  %vm59_vm0 = vcmask 523264   ;;  %s1879_s0 = inlined_call_operand.vmem [shape: f32[128,64], index: 0, kind: input, shape index: {}]   ;;  %s1880_s1 = inlined_call_operand.vmem [shape: f32[64,128], index: 1, kind: input, shape index: {}]   ;;  %s1881_s2 = inlined_call_operand.vmem [shape: f32[8,128], index: 2, kind: input, shape index: {}]   ;;  %s1882_s3 = inlined_call_operand.vmem [shape: f32[8,128], index: 3, kind: input, shape index: {}]   ;;  %s1883_s4 = inlined_call_operand.hbm [shape: bf16[1024,128], index: 4, kind: output, shape index: {0}]   ;;  %s1884_s5 = inlined_call_operand.hbm [shape: f32[8,128], index: 5, kind: output, shape index: {1}]   ;;  %s1885_s6 = inlined_call_operand.vmem [shape: f32[128,8], index: 6, kind: output, shape index: {2}]  }
   0x1   :  { %v53_v0 = vld [vmem:[%s1880_s1 + $0x30] sm:$0xff]  ;;  %v54_v1 = vld [vmem:[%s1880_s1 + $0x38] sm:$0xff]  ;;  %v51_v2 = vld [vmem:[%s1880_s1 + $0x20] sm:$0xff] }
   0x2   :  { %v58_v3 = vpack.c.bf16 %v54_v1, %v53_v0  ;;  %v52_v4 = vld [vmem:[%s1880_s1 + $0x28] sm:$0xff]  ;;  %v49_v6 = vld [vmem:[%s1880_s1 + $0x10] sm:$0xff]  ;;  %v50_v7 = vld [vmem:[%s1880_s1 + $0x18] sm:$0xff] }
   0x3   :  { %v57_v5 = vpack.c.bf16 %v52_v4, %v51_v2  ;;  %v23_v8 = vld [vmem:[%s1879_s0] sm:$0xff]  ;;  %v24_v9 = vld [vmem:[%s1879_s0 + $0x8] sm:$0xff]  ;;  %v56_v11 = vpack.c.bf16 %v50_v7, %v49_v6 }
   0x4   :  { %1338 = vmatprep.subr.bf16.mxu0 %v58_v3  ;;  %v39_v10 = vpack.c.bf16 %v24_v9, %v23_v8  ;;  %v47_v12 = vld [vmem:[%s1880_s1] sm:$0xff]  ;;  %v48_v13 = vld [vmem:[%s1880_s1 + $0x8] sm:$0xff] }
   0x5   :  { %1339 = vmatpush3.bf16.msra.mxu0 %v58_v3 }
   0x6   :  { %1340 = vmatprep.subr.bf16.mxu0 %v57_v5  ;;  %1346 = vmatprep.mubr.msk.bf16.mxu0 %vm59_vm0, %v39_v10 }
   0x9   :  { %1341 = vmatpush3.bf16.msra.mxu0 %v57_v5 }
   0xa   :  { %13 = vsyncpa [#allocation5], 0  ;;  %1342 = vmatprep.subr.bf16.mxu0 %v56_v11  ;;  %v55_v14 = vpack.c.bf16 %v48_v13, %v47_v12  ;;  %v25_v15 = vld [vmem:[%s1879_s0 + $0x10] sm:$0xff]  ;;  %v26_v16 = vld [vmem:[%s1879_s0 + $0x18] sm:$0xff]  ;;  %v1475_v37 = vmov 0.0   ;;  %vm1476_vm1 = vmmov 0   ;;  %v424_v38 = vlaneseq }
   0xb   :  { %v27_v17 = vld [vmem:[%s1879_s0 + $0x20] sm:$0xff]  ;;  %v28_v18 = vld [vmem:[%s1879_s0 + $0x28] sm:$0xff]  ;;  %v40_v19 = vpack.c.bf16 %v26_v16, %v25_v15  ;;  %v29_v21 = vld [vmem:[%s1879_s0 + $0x30] sm:$0xff]  ;;  %1362 = vmatprep.subr.mxu1 %v1475_v37  ;;  %1394 = vmatprep.mubr.msk.f32.mxu1 %vm1476_vm1, %v1475_v37  ;;  %v1886_v40 = vmov 0  ;;  %s1477_s22 = smov [#allocation2]  }
   0xc   :  { %v41_v20 = vpack.c.bf16 %v28_v18, %v27_v17  ;;  %v30_v22 = vld [vmem:[%s1879_s0 + $0x38] sm:$0xff]  ;;  %v31_v23 = vld [vmem:[%s1879_s0 + $0x40] sm:$0xff]  ;;  %v32_v24 = vld [vmem:[%s1879_s0 + $0x48] sm:$0xff]  ;;  %v425_v39 = vand.u32 127, %v424_v38  ;;  %s1119_s1 = sshll.u32 %s1477_s22, 4  ;;  %s1120_s1 = int_to_ptr.vmem [resolvable:$true] %s1119_s1 }
   0xd   :  { %1343 = vmatpush3.bf16.msra.mxu0 %v56_v11  ;;  %v42_v25 = vpack.c.bf16 %v30_v22, %v29_v21  ;;  %v43_v26 = vpack.c.bf16 %v32_v24, %v31_v23  ;;  %v33_v27 = vld [vmem:[%s1879_s0 + $0x50] sm:$0xff]  ;;  %v34_v28 = vld [vmem:[%s1879_s0 + $0x58] sm:$0xff]  ;;  %v35_v29 = vld [vmem:[%s1879_s0 + $0x60] sm:$0xff]  ;;  %s1431_s23 = scalar_lea.vmem %s1120_s1, 8192  ;;  %p1436_p1 = scmp.lt.s32.totalorder %s1120_s1, %s1120_s1 }
   0xe   :  { %1344 = vmatprep.subr.bf16.mxu0 %v55_v14  ;;  %v36_v30 = vld [vmem:[%s1879_s0 + $0x68] sm:$0xff]  ;;  %v44_v31 = vpack.c.bf16 %v34_v28, %v33_v27  ;;  %v37_v33 = vld [vmem:[%s1879_s0 + $0x70] sm:$0xff]  ;;  %v38_v34 = vld [vmem:[%s1879_s0 + $0x78] sm:$0xff]  ;;  %vm512_vm2 = vcmp.ge.s32.totalorder %v425_v39, 16  ;;  %vm513_vm3 = vcmp.lt.s32.totalorder %v425_v39, 32  ;;  %vm598_vm4 = vcmp.ge.s32.totalorder %v425_v39, 32  ;;  %p1432_p0 = scmp.ne.s32.totalorder %s1120_s1, %s1431_s23  ;;  %p1437_p2 = scmp.lt.s32.totalorder %s1431_s23, %s1431_s23 }
   0xf   :  { %v45_v32 = vpack.c.bf16 %v36_v30, %v35_v29  ;;  %v46_v35 = vpack.c.bf16 %v38_v34, %v37_v33  ;;  %v1599_v36 = vld [vmem:[%s1882_s3] sm:$0xff]  ;;  %vm599_vm5 = vcmp.lt.s32.totalorder %v425_v39, 48  ;;  %vm684_vm6 = vcmp.ge.s32.totalorder %v425_v39, 48  ;;  %vm1605_vm8 = vmand %vm512_vm2, %vm513_vm3 }
  0x10   :  { %vm685_vm7 = vcmp.lt.s32.totalorder %v425_v39, 64  ;;  %v1887_v40 = vsel %vm1605_vm8, 4294967295, %v1886_v40  ;;  %vm770_vm9 = vcmp.ge.s32.totalorder %v425_v39, 64  ;;  %vm771_vm10 = vcmp.lt.s32.totalorder %v425_v39, 80  ;;  %vm600_vm11 = vmand %vm598_vm4, %vm599_vm5  ;;  %p1438_p3 = por %p1437_p2, %p1436_p1 }
  0x11   :  { %1345 = vmatpush3.bf16.msra.mxu0 %v55_v14  ;;  %vm856_vm12 = vcmp.ge.s32.totalorder %v425_v39, 80  ;;  %vm857_vm13 = vcmp.lt.s32.totalorder %v425_v39, 96  ;;  %vm686_vm14 = vmand %vm684_vm6, %vm685_vm7  ;;  %vm942_vm15 = vcmp.ge.s32.totalorder %v425_v39, 96  ;;  %vm427_vm2 = vcmp.lt.s32.totalorder %v425_v39, 16 }
  0x12   :  { %1397 = vmatprep.subr.mxu0 %v1599_v36  ;;  %vm772_vm1 = vmand %vm770_vm9, %vm771_vm10  ;;  %vm1028_vm4 = vcmp.ge.s32.totalorder %v425_v39, 112  ;;  %v1156_v42 = vsel %vm427_vm2, 1.0, %v1475_v37  ;;  %vm1888_vm5 = vnez %v1887_v40  ;;  %v1190_v44 = vsel %vm600_vm11, 1.0, %v1475_v37  ;;  %p1439_p4 = pnand %p1438_p3, %p1432_p0 }
  0x13   :  { %vm858_vm3 = vmand %vm856_vm12, %vm857_vm13  ;;  %v1173_v43 = vsel %vm1888_vm5, 1.0, %v1475_v37  ;;  %v1207_v45 = vsel %vm686_vm14, 1.0, %v1475_v37  ;;  %v1224_v46 = vsel %vm772_vm1, 1.0, %v1475_v37  ;;  %v1275_v49 = vsel %vm1028_vm4, 1.0, %v1475_v37 }
  0x14   :  { %1347 = vmatmul.mubr.msk.bf16.vlgmr.msra.gmra.mxu0 %vm59_vm0, %v40_v19  ;;  %v1241_v47 = vsel %vm858_vm3, 1.0, %v1475_v37  ;;  %v1624_v51 = vpack.c.bf16 %v1156_v42, %v1156_v42  ;;  %v1626_v52 = vpack.c.bf16 %v1173_v43, %v1173_v43  ;;  %v1628_v53 = vpack.c.bf16 %v1190_v44, %v1190_v44 }
  0x15   :  { %1350 = vmatprep.mubr.msk.bf16.mxu0 %vm59_vm0, %v41_v20  ;;  %1398 = vmatpush3.xpose.msra.mxu0 %v1599_v36  ;;  %v1630_v54 = vpack.c.bf16 %v1207_v45, %v1207_v45  ;;  %v1634_v56 = vpack.c.bf16 %v1224_v46, %v1224_v46  ;;  %v1636_v57 = vpack.c.bf16 %v1241_v47, %v1241_v47 }
  0x16   :  { %v1640_v59 = vpack.c.bf16 %v1275_v49, %v1275_v49 }
  0x1c   :  { %1351 = vmatmul.mubr.msk.bf16.gmra.mxu0 %vm59_vm0, %v42_v25 }
  0x1d   :  { %1354 = vmatprep.mubr.msk.bf16.mxu0 %vm59_vm0, %v43_v26 }
  0x24   :  { %1355 = vmatmul.mubr.msk.bf16.gmra.mxu0 %vm59_vm0, %v44_v31 }
  0x25   :  { %1358 = vmatprep.mubr.msk.bf16.mxu0 %vm59_vm0, %v45_v32 }
  0x2c   :  { %1359 = vmatmul.mubr.msk.bf16.gmra.mxu0 %vm59_vm0, %v46_v35  ;;  %vm943_vm0 = vcmp.lt.s32.totalorder %v425_v39, 112 }
  0x2d   :  { %vm944_vm8 = vmand %vm942_vm15, %vm943_vm0 }
  0x2e   :  { %v1258_v48 = vsel %vm944_vm8, 1.0, %v1475_v37 }
  0x2f   :  { %v1638_v58 = vpack.c.bf16 %v1258_v48, %v1258_v48 }
  0xd4   :  { %v1609_v41 = vpop.f32.mrf.mxu0 }
  0xd6   :  { %v1621_v50 = vpop.f32.mrf.mxu0 }
  0xd7   :  { %1399 = vmatprep.mubr.f32.mxu0 %v1621_v50 }
  0xd8   :  { %v1632_v55 = vpop.f32.mrf.mxu0 }
  0xd9   :  { %v417_v60 = vpack.c.bf16 %v1632_v55, %v1609_v41 }
  0xda   :  { %v1644_v61 = vpop.f32.mrf.mxu0 }
  0xdb   :  { %v433_v62 = vmul.bf16 %v1624_v51, %v417_v60  ;;  %v519_v63 = vmul.bf16 %v1626_v52, %v417_v60  ;;  %v605_v0 = vmul.bf16 %v1628_v53, %v417_v60  ;;  %v691_v1 = vmul.bf16 %v1630_v54, %v417_v60  ;;  %1400 = vmatmul.mubr.f32.vlgmr.msra.gmra.mxu0 %v1644_v61 }
  0xdc   :  { %v777_v2 = vmul.bf16 %v1634_v56, %v417_v60  ;;  %v863_v3 = vmul.bf16 %v1636_v57, %v417_v60  ;;  %v949_v4 = vmul.bf16 %v1638_v58, %v417_v60  ;;  %v1035_v5 = vmul.bf16 %v1640_v59, %v417_v60  ;;  %v1655_v6 = vpop.f32.mrf.mxu0  ;;  %1402 = vmatprep.mubr.f32.mxu0 %v1609_v41 }
  0xdd   :  { %v1159_v7 = vcombine.low %v433_v62, %v433_v62  ;;  %v1160_v8 = vcombine.high %v433_v62, %v433_v62  ;;  %v1176_v9 = vcombine.low %v519_v63, %v519_v63  ;;  %v1177_v10 = vcombine.high %v519_v63, %v519_v63 }
  0xde   :  { %v1193_v11 = vcombine.low %v605_v0, %v605_v0  ;;  %v1194_v12 = vcombine.high %v605_v0, %v605_v0  ;;  %v1210_v13 = vcombine.low %v691_v1, %v691_v1  ;;  %v1211_v14 = vcombine.high %v691_v1, %v691_v1  ;;  %v1658_v15 = vpop.f32.mrf.mxu0 }
  0xdf   :  { %498 = vst [vmem:[#allocation2 + $0x8] sm:$0xf] %v1159_v7  ;;  %499 = vst [vmem:[#allocation2 + $0xc] sm:$0xf] %v1160_v8  ;;  %v1227_v16 = vcombine.low %v777_v2, %v777_v2  ;;  %v1228_v17 = vcombine.high %v777_v2, %v777_v2  ;;  %v1244_v18 = vcombine.low %v863_v3, %v863_v3  ;;  %1403 = vmatmul.mubr.f32.gmra.mxu0 %v1632_v55 }
  0xe0   :  { %584 = vst [vmem:[#allocation2 + $0x48] sm:$0xf] %v1176_v9  ;;  %585 = vst [vmem:[#allocation2 + $0x4c] sm:$0xf] %v1177_v10  ;;  %v1245_v19 = vcombine.high %v863_v3, %v863_v3  ;;  %v1261_v20 = vcombine.low %v949_v4, %v949_v4  ;;  %v1262_v21 = vcombine.high %v949_v4, %v949_v4  ;;  %v1661_v24 = vpop.f32.mrf.mxu0  ;;  %1405 = vmatprep.mubr.f32.mxu0 %v1658_v15 }
  0xe1   :  { %670 = vst [vmem:[#allocation2 + $0x88] sm:$0xf] %v1193_v11  ;;  %671 = vst [vmem:[#allocation2 + $0x8c] sm:$0xf] %v1194_v12  ;;  %v1278_v22 = vcombine.low %v1035_v5, %v1035_v5  ;;  %v1279_v23 = vcombine.high %v1035_v5, %v1035_v5  ;;  %v416_v25 = vpack.c.bf16 %v1644_v61, %v1621_v50 }
  0xe2   :  { %756 = vst [vmem:[#allocation2 + $0xc8] sm:$0xf] %v1210_v13  ;;  %757 = vst [vmem:[#allocation2 + $0xcc] sm:$0xf] %v1211_v14  ;;  %v419_v26 = vpack.c.bf16 %v1661_v24, %v1655_v6  ;;  %v1668_v27 = vpop.f32.mrf.mxu0 }
  0xe3   :  { %842 = vst [vmem:[#allocation2 + $0x108] sm:$0xf] %v1227_v16  ;;  %843 = vst [vmem:[#allocation2 + $0x10c] sm:$0xf] %v1228_v17  ;;  %v432_v28 = vmul.bf16 %v1624_v51, %v416_v25  ;;  %v518_v29 = vmul.bf16 %v1626_v52, %v416_v25  ;;  %v604_v30 = vmul.bf16 %v1628_v53, %v416_v25  ;;  %1406 = vmatmul.mubr.f32.gmra.mxu0 %v1668_v27 }
  0xe4   :  { %928 = vst [vmem:[#allocation2 + $0x148] sm:$0xf] %v1244_v18  ;;  %929 = vst [vmem:[#allocation2 + $0x14c] sm:$0xf] %v1245_v19  ;;  %v690_v31 = vmul.bf16 %v1630_v54, %v416_v25  ;;  %v776_v32 = vmul.bf16 %v1634_v56, %v416_v25  ;;  %v862_v33 = vmul.bf16 %v1636_v57, %v416_v25  ;;  %v1679_v38 = vpop.f32.mrf.mxu0  ;;  %1408 = vmatprep.mubr.f32.mxu0 %v1655_v6 }
  0xe5   :  { %1014 = vst [vmem:[#allocation2 + $0x188] sm:$0xf] %v1261_v20  ;;  %1015 = vst [vmem:[#allocation2 + $0x18c] sm:$0xf] %v1262_v21  ;;  %v948_v34 = vmul.bf16 %v1638_v58, %v416_v25  ;;  %v1034_v35 = vmul.bf16 %v1640_v59, %v416_v25  ;;  %v1157_v39 = vcombine.low %v432_v28, %v432_v28 }
  0xe6   :  { %1100 = vst [vmem:[#allocation2 + $0x1c8] sm:$0xf] %v1278_v22  ;;  %1101 = vst [vmem:[#allocation2 + $0x1cc] sm:$0xf] %v1279_v23  ;;  %v1158_v40 = vcombine.high %v432_v28, %v432_v28  ;;  %v1174_v42 = vcombine.low %v518_v29, %v518_v29  ;;  %v1175_v43 = vcombine.high %v518_v29, %v518_v29  ;;  %v1682_v48 = vpop.f32.mrf.mxu0 }
  0xe7   :  { %v1191_v44 = vcombine.low %v604_v30, %v604_v30  ;;  %v1192_v45 = vcombine.high %v604_v30, %v604_v30  ;;  %v1208_v46 = vcombine.low %v690_v31, %v690_v31  ;;  %v1209_v47 = vcombine.high %v690_v31, %v690_v31  ;;  %496 = vst [vmem:[#allocation2] sm:$0xf] %v1157_v39 }
  0xe8   :  { %497 = vst [vmem:[#allocation2 + $0x4] sm:$0xf] %v1158_v40  ;;  %582 = vst [vmem:[#allocation2 + $0x40] sm:$0xf] %v1174_v42  ;;  %v1225_v49 = vcombine.low %v776_v32, %v776_v32  ;;  %v1226_v60 = vcombine.high %v776_v32, %v776_v32  ;;  %v1242_v62 = vcombine.low %v862_v33, %v862_v33  ;;  %1409 = vmatmul.mubr.f32.gmra.mxu0 %v1661_v24  ;;  %v1685_v4 = vpop.f32.mrf.mxu0 }
  0xe9   :  { %583 = vst [vmem:[#allocation2 + $0x44] sm:$0xf] %v1175_v43  ;;  %v1243_v63 = vcombine.high %v862_v33, %v862_v33  ;;  %668 = vst [vmem:[#allocation2 + $0x80] sm:$0xf] %v1191_v44  ;;  %v1259_v0 = vcombine.low %v948_v34, %v948_v34  ;;  %v1260_v1 = vcombine.high %v948_v34, %v948_v34  ;;  %1411 = vmatprep.mubr.f32.mxu0 %v1682_v48 }
  0xea   :  { %669 = vst [vmem:[#allocation2 + $0x84] sm:$0xf] %v1192_v45  ;;  %754 = vst [vmem:[#allocation2 + $0xc0] sm:$0xf] %v1208_v46  ;;  %v1276_v2 = vcombine.low %v1034_v35, %v1034_v35  ;;  %v1277_v3 = vcombine.high %v1034_v35, %v1034_v35  ;;  %v435_v5 = vmul.bf16 %v1624_v51, %v419_v26  ;;  %v1696_v14 = vpop.f32.mrf.mxu0 }
  0xeb   :  { %755 = vst [vmem:[#allocation2 + $0xc4] sm:$0xf] %v1209_v47  ;;  %840 = vst [vmem:[#allocation2 + $0x100] sm:$0xf] %v1225_v49  ;;  %v521_v7 = vmul.bf16 %v1626_v52, %v419_v26  ;;  %v607_v8 = vmul.bf16 %v1628_v53, %v419_v26  ;;  %v693_v9 = vmul.bf16 %v1630_v54, %v419_v26 }
  0xec   :  { %841 = vst [vmem:[#allocation2 + $0x104] sm:$0xf] %v1226_v60  ;;  %926 = vst [vmem:[#allocation2 + $0x140] sm:$0xf] %v1242_v62  ;;  %v779_v10 = vmul.bf16 %v1634_v56, %v419_v26  ;;  %v865_v11 = vmul.bf16 %v1636_v57, %v419_v26  ;;  %v951_v12 = vmul.bf16 %v1638_v58, %v419_v26  ;;  %1412 = vmatmul.mubr.f32.gmra.mxu0 %v1696_v14  ;;  %v1699_v25 = vpop.f32.mrf.mxu0 }
  0xed   :  { %927 = vst [vmem:[#allocation2 + $0x144] sm:$0xf] %v1243_v63  ;;  %1012 = vst [vmem:[#allocation2 + $0x180] sm:$0xf] %v1259_v0  ;;  %v1037_v13 = vmul.bf16 %v1640_v59, %v419_v26  ;;  %v1163_v16 = vcombine.low %v435_v5, %v435_v5  ;;  %v1164_v17 = vcombine.high %v435_v5, %v435_v5  ;;  %1414 = vmatprep.mubr.f32.mxu0 %v1679_v38 }
  0xee   :  { %1013 = vst [vmem:[#allocation2 + $0x184] sm:$0xf] %v1260_v1  ;;  %1098 = vst [vmem:[#allocation2 + $0x1c0] sm:$0xf] %v1276_v2  ;;  %v1180_v18 = vcombine.low %v521_v7, %v521_v7  ;;  %v1181_v19 = vcombine.high %v521_v7, %v521_v7  ;;  %v1197_v20 = vcombine.low %v607_v8, %v607_v8  ;;  %v1702_v35 = vpop.f32.mrf.mxu0 }
  0xef   :  { %1099 = vst [vmem:[#allocation2 + $0x1c4] sm:$0xf] %v1277_v3  ;;  %v1198_v21 = vcombine.high %v607_v8, %v607_v8  ;;  %v1214_v22 = vcombine.low %v693_v9, %v693_v9  ;;  %v1215_v23 = vcombine.high %v693_v9, %v693_v9  ;;  %502 = vst [vmem:[#allocation2 + $0x18] sm:$0xf] %v1163_v16 }
  0xf0   :  { %503 = vst [vmem:[#allocation2 + $0x1c] sm:$0xf] %v1164_v17  ;;  %588 = vst [vmem:[#allocation2 + $0x58] sm:$0xf] %v1180_v18  ;;  %v1231_v26 = vcombine.low %v779_v10, %v779_v10  ;;  %v1232_v28 = vcombine.high %v779_v10, %v779_v10  ;;  %v1248_v29 = vcombine.low %v865_v11, %v865_v11  ;;  %1415 = vmatmul.mubr.f32.gmra.mxu0 %v1685_v4  ;;  %v1713_v43 = vpop.f32.mrf.mxu0 }
  0xf1   :  { %589 = vst [vmem:[#allocation2 + $0x5c] sm:$0xf] %v1181_v19  ;;  %v1249_v30 = vcombine.high %v865_v11, %v865_v11  ;;  %674 = vst [vmem:[#allocation2 + $0x98] sm:$0xf] %v1197_v20  ;;  %v1265_v31 = vcombine.low %v951_v12, %v951_v12  ;;  %v1266_v32 = vcombine.high %v951_v12, %v951_v12  ;;  %1417 = vmatprep.mubr.f32.mxu0 %v1702_v35 }
  0xf2   :  { %675 = vst [vmem:[#allocation2 + $0x9c] sm:$0xf] %v1198_v21  ;;  %760 = vst [vmem:[#allocation2 + $0xd8] sm:$0xf] %v1214_v22  ;;  %v1282_v33 = vcombine.low %v1037_v13, %v1037_v13  ;;  %v1283_v34 = vcombine.high %v1037_v13, %v1037_v13  ;;  %v418_v39 = vpack.c.bf16 %v1668_v27, %v1658_v15  ;;  %1363 = vmatpush3.xpose.msra.mxu1 %v1713_v43  ;;  %v1725_v0 = vpop.f32.mrf.mxu0 }
  0xf3   :  { %761 = vst [vmem:[#allocation2 + $0xdc] sm:$0xf] %v1215_v23  ;;  %846 = vst [vmem:[#allocation2 + $0x118] sm:$0xf] %v1231_v26  ;;  %v421_v40 = vpack.c.bf16 %v1685_v4, %v1679_v38  ;;  %v1711_v42 = vpack.c.bf16 %v1696_v14, %v1682_v48  ;;  %1364 = vmatprep.subr.mxu1 %v1475_v37 }
  0xf4   :  { %847 = vst [vmem:[#allocation2 + $0x11c] sm:$0xf] %v1232_v28  ;;  %932 = vst [vmem:[#allocation2 + $0x158] sm:$0xf] %v1248_v29  ;;  %v434_v44 = vmul.bf16 %v1624_v51, %v418_v39  ;;  %v520_v45 = vmul.bf16 %v1626_v52, %v418_v39  ;;  %v606_v46 = vmul.bf16 %v1628_v53, %v418_v39  ;;  %1418 = vmatmul.mubr.f32.gmra.mxu0 %v1725_v0 }
  0xf5   :  { %933 = vst [vmem:[#allocation2 + $0x15c] sm:$0xf] %v1249_v30  ;;  %1018 = vst [vmem:[#allocation2 + $0x198] sm:$0xf] %v1265_v31  ;;  %v692_v47 = vmul.bf16 %v1630_v54, %v418_v39  ;;  %v778_v49 = vmul.bf16 %v1634_v56, %v418_v39  ;;  %v864_v60 = vmul.bf16 %v1636_v57, %v418_v39 }
  0xf6   :  { %1019 = vst [vmem:[#allocation2 + $0x19c] sm:$0xf] %v1266_v32  ;;  %1104 = vst [vmem:[#allocation2 + $0x1d8] sm:$0xf] %v1282_v33  ;;  %v950_v62 = vmul.bf16 %v1638_v58, %v418_v39  ;;  %v1036_v63 = vmul.bf16 %v1640_v59, %v418_v39  ;;  %v1161_v1 = vcombine.low %v434_v44, %v434_v44  ;;  %1365 = vmatpush3.xpose.msra.mxu1 %v1699_v25 }
  0xf7   :  { %1105 = vst [vmem:[#allocation2 + $0x1dc] sm:$0xf] %v1283_v34  ;;  %v1162_v2 = vcombine.high %v434_v44, %v434_v44  ;;  %v1178_v3 = vcombine.low %v520_v45, %v520_v45  ;;  %v1179_v5 = vcombine.high %v520_v45, %v520_v45  ;;  %v1195_v7 = vcombine.low %v606_v46, %v606_v46 }
  0xf8   :  { %v1196_v8 = vcombine.high %v606_v46, %v606_v46  ;;  %v1212_v9 = vcombine.low %v692_v47, %v692_v47  ;;  %v1213_v10 = vcombine.high %v692_v47, %v692_v47  ;;  %500 = vst [vmem:[#allocation2 + $0x10] sm:$0xf] %v1161_v1  ;;  %v1229_v11 = vcombine.low %v778_v49, %v778_v49 }
  0xf9   :  { %501 = vst [vmem:[#allocation2 + $0x14] sm:$0xf] %v1162_v2  ;;  %586 = vst [vmem:[#allocation2 + $0x50] sm:$0xf] %v1178_v3  ;;  %v1230_v12 = vcombine.high %v778_v49, %v778_v49  ;;  %v1246_v13 = vcombine.low %v864_v60, %v864_v60  ;;  %v1247_v16 = vcombine.high %v864_v60, %v864_v60  ;;  %1366 = vmatprep.subr.mxu1 %v1475_v37 }
  0xfa   :  { %587 = vst [vmem:[#allocation2 + $0x54] sm:$0xf] %v1179_v5  ;;  %672 = vst [vmem:[#allocation2 + $0x90] sm:$0xf] %v1195_v7  ;;  %v1263_v17 = vcombine.low %v950_v62, %v950_v62  ;;  %v1264_v18 = vcombine.high %v950_v62, %v950_v62  ;;  %v1280_v19 = vcombine.low %v1036_v63, %v1036_v63  ;;  %1367 = vmatpush3.xpose.msra.mxu1 %v1725_v0 }
  0xfb   :  { %673 = vst [vmem:[#allocation2 + $0x94] sm:$0xf] %v1196_v8  ;;  %758 = vst [vmem:[#allocation2 + $0xd0] sm:$0xf] %v1212_v9  ;;  %v1281_v20 = vcombine.high %v1036_v63, %v1036_v63  ;;  %v437_v21 = vmul.bf16 %v1624_v51, %v421_v40  ;;  %v523_v22 = vmul.bf16 %v1626_v52, %v421_v40  ;;  %1368 = vmatprep.subr.mxu1 %v1475_v37 }
  0xfc   :  { %759 = vst [vmem:[#allocation2 + $0xd4] sm:$0xf] %v1213_v10  ;;  %844 = vst [vmem:[#allocation2 + $0x110] sm:$0xf] %v1229_v11  ;;  %v609_v23 = vmul.bf16 %v1628_v53, %v421_v40  ;;  %v695_v26 = vmul.bf16 %v1630_v54, %v421_v40  ;;  %v781_v28 = vmul.bf16 %v1634_v56, %v421_v40 }
  0xfd   :  { %845 = vst [vmem:[#allocation2 + $0x114] sm:$0xf] %v1230_v12  ;;  %930 = vst [vmem:[#allocation2 + $0x150] sm:$0xf] %v1246_v13  ;;  %v867_v29 = vmul.bf16 %v1636_v57, %v421_v40  ;;  %v953_v30 = vmul.bf16 %v1638_v58, %v421_v40  ;;  %v1039_v31 = vmul.bf16 %v1640_v59, %v421_v40 }
  0xfe   :  { %931 = vst [vmem:[#allocation2 + $0x154] sm:$0xf] %v1247_v16  ;;  %1016 = vst [vmem:[#allocation2 + $0x190] sm:$0xf] %v1263_v17  ;;  %v1167_v32 = vcombine.low %v437_v21, %v437_v21  ;;  %v1168_v33 = vcombine.high %v437_v21, %v437_v21  ;;  %v1184_v34 = vcombine.low %v523_v22, %v523_v22  ;;  %1369 = vmatpush3.xpose.msra.mxu1 %v1702_v35 }
  0xff   :  { %1017 = vst [vmem:[#allocation2 + $0x194] sm:$0xf] %v1264_v18  ;;  %1102 = vst [vmem:[#allocation2 + $0x1d0] sm:$0xf] %v1280_v19  ;;  %v1185_v39 = vcombine.high %v523_v22, %v523_v22  ;;  %v1201_v44 = vcombine.low %v609_v23, %v609_v23  ;;  %v1202_v45 = vcombine.high %v609_v23, %v609_v23  ;;  %1370 = vmatprep.subr.mxu1 %v1475_v37 }
 0x100   :  { %1103 = vst [vmem:[#allocation2 + $0x1d4] sm:$0xf] %v1281_v20  ;;  %v1218_v46 = vcombine.low %v695_v26, %v695_v26  ;;  %v1219_v47 = vcombine.high %v695_v26, %v695_v26  ;;  %506 = vst [vmem:[#allocation2 + $0x28] sm:$0xf] %v1167_v32  ;;  %v1235_v49 = vcombine.low %v781_v28, %v781_v28 }
 0x101   :  { %507 = vst [vmem:[#allocation2 + $0x2c] sm:$0xf] %v1168_v33  ;;  %592 = vst [vmem:[#allocation2 + $0x68] sm:$0xf] %v1184_v34  ;;  %v1236_v60 = vcombine.high %v781_v28, %v781_v28  ;;  %v1252_v62 = vcombine.low %v867_v29, %v867_v29  ;;  %v1253_v40 = vcombine.high %v867_v29, %v867_v29 }
 0x102   :  { %593 = vst [vmem:[#allocation2 + $0x6c] sm:$0xf] %v1185_v39  ;;  %678 = vst [vmem:[#allocation2 + $0xa8] sm:$0xf] %v1201_v44  ;;  %v1269_v63 = vcombine.low %v953_v30, %v953_v30  ;;  %v1270_v1 = vcombine.high %v953_v30, %v953_v30  ;;  %v1286_v2 = vcombine.low %v1039_v31, %v1039_v31  ;;  %1371 = vmatpush3.xpose.msra.mxu1 %v1685_v4 }
 0x103   :  { %679 = vst [vmem:[#allocation2 + $0xac] sm:$0xf] %v1202_v45  ;;  %764 = vst [vmem:[#allocation2 + $0xe8] sm:$0xf] %v1218_v46  ;;  %v1287_v3 = vcombine.high %v1039_v31, %v1039_v31  ;;  %v436_v5 = vmul.bf16 %v1624_v51, %v1711_v42  ;;  %v522_v7 = vmul.bf16 %v1626_v52, %v1711_v42  ;;  %1372 = vmatprep.subr.mxu1 %v1475_v37 }
 0x104   :  { %765 = vst [vmem:[#allocation2 + $0xec] sm:$0xf] %v1219_v47  ;;  %850 = vst [vmem:[#allocation2 + $0x128] sm:$0xf] %v1235_v49  ;;  %v608_v8 = vmul.bf16 %v1628_v53, %v1711_v42  ;;  %v694_v9 = vmul.bf16 %v1630_v54, %v1711_v42  ;;  %v780_v10 = vmul.bf16 %v1634_v56, %v1711_v42 }
 0x105   :  { %851 = vst [vmem:[#allocation2 + $0x12c] sm:$0xf] %v1236_v60  ;;  %936 = vst [vmem:[#allocation2 + $0x168] sm:$0xf] %v1252_v62  ;;  %v866_v11 = vmul.bf16 %v1636_v57, %v1711_v42  ;;  %v952_v12 = vmul.bf16 %v1638_v58, %v1711_v42  ;;  %v1038_v13 = vmul.bf16 %v1640_v59, %v1711_v42 }
 0x106   :  { %937 = vst [vmem:[#allocation2 + $0x16c] sm:$0xf] %v1253_v40  ;;  %1022 = vst [vmem:[#allocation2 + $0x1a8] sm:$0xf] %v1269_v63  ;;  %v1165_v16 = vcombine.low %v436_v5, %v436_v5  ;;  %v1166_v17 = vcombine.high %v436_v5, %v436_v5  ;;  %v1182_v18 = vcombine.low %v522_v7, %v522_v7  ;;  %1373 = vmatpush3.xpose.msra.mxu1 %v1679_v38 }
 0x107   :  { %1023 = vst [vmem:[#allocation2 + $0x1ac] sm:$0xf] %v1270_v1  ;;  %1108 = vst [vmem:[#allocation2 + $0x1e8] sm:$0xf] %v1286_v2  ;;  %v1183_v19 = vcombine.high %v522_v7, %v522_v7  ;;  %v1199_v20 = vcombine.low %v608_v8, %v608_v8  ;;  %v1200_v21 = vcombine.high %v608_v8, %v608_v8  ;;  %1374 = vmatprep.subr.mxu1 %v1475_v37 }
 0x108   :  { %1109 = vst [vmem:[#allocation2 + $0x1ec] sm:$0xf] %v1287_v3  ;;  %v1216_v22 = vcombine.low %v694_v9, %v694_v9  ;;  %v1217_v23 = vcombine.high %v694_v9, %v694_v9  ;;  %504 = vst [vmem:[#allocation2 + $0x20] sm:$0xf] %v1165_v16  ;;  %v1233_v26 = vcombine.low %v780_v10, %v780_v10 }
 0x109   :  { %505 = vst [vmem:[#allocation2 + $0x24] sm:$0xf] %v1166_v17  ;;  %590 = vst [vmem:[#allocation2 + $0x60] sm:$0xf] %v1182_v18  ;;  %v1234_v28 = vcombine.high %v780_v10, %v780_v10  ;;  %v1250_v29 = vcombine.low %v866_v11, %v866_v11  ;;  %v1251_v30 = vcombine.high %v866_v11, %v866_v11 }
 0x10a   :  { %591 = vst [vmem:[#allocation2 + $0x64] sm:$0xf] %v1183_v19  ;;  %676 = vst [vmem:[#allocation2 + $0xa0] sm:$0xf] %v1199_v20  ;;  %v1267_v42 = vcombine.low %v952_v12, %v952_v12  ;;  %v1268_v31 = vcombine.high %v952_v12, %v952_v12  ;;  %v1284_v32 = vcombine.low %v1038_v13, %v1038_v13  ;;  %1375 = vmatpush3.xpose.msra.mxu1 %v1696_v14 }
 0x10b   :  { %677 = vst [vmem:[#allocation2 + $0xa4] sm:$0xf] %v1200_v21  ;;  %762 = vst [vmem:[#allocation2 + $0xe0] sm:$0xf] %v1216_v22  ;;  %v1285_v33 = vcombine.high %v1038_v13, %v1038_v13  ;;  %v423_v34 = vpack.c.bf16 %v1713_v43, %v1699_v25  ;;  %v422_v4 = vpack.c.bf16 %v1725_v0, %v1702_v35  ;;  %1376 = vmatprep.subr.mxu1 %v1475_v37 }
 0x10c   :  { %763 = vst [vmem:[#allocation2 + $0xe4] sm:$0xf] %v1217_v23  ;;  %848 = vst [vmem:[#allocation2 + $0x120] sm:$0xf] %v1233_v26 }
 0x10d   :  { %849 = vst [vmem:[#allocation2 + $0x124] sm:$0xf] %v1234_v28  ;;  %934 = vst [vmem:[#allocation2 + $0x160] sm:$0xf] %v1250_v29  ;;  %v439_v39 = vmul.bf16 %v1624_v51, %v423_v34  ;;  %v525_v44 = vmul.bf16 %v1626_v52, %v423_v34  ;;  %v611_v45 = vmul.bf16 %v1628_v53, %v423_v34 }
 0x10e   :  { %935 = vst [vmem:[#allocation2 + $0x164] sm:$0xf] %v1251_v30  ;;  %1020 = vst [vmem:[#allocation2 + $0x1a0] sm:$0xf] %v1267_v42  ;;  %v697_v46 = vmul.bf16 %v1630_v54, %v423_v34  ;;  %v783_v47 = vmul.bf16 %v1634_v56, %v423_v34  ;;  %v869_v49 = vmul.bf16 %v1636_v57, %v423_v34  ;;  %1377 = vmatpush3.xpose.msra.mxu1 %v1682_v48 }
 0x10f   :  { %1021 = vst [vmem:[#allocation2 + $0x1a4] sm:$0xf] %v1268_v31  ;;  %1106 = vst [vmem:[#allocation2 + $0x1e0] sm:$0xf] %v1284_v32  ;;  %v955_v60 = vmul.bf16 %v1638_v58, %v423_v34  ;;  %v1041_v62 = vmul.bf16 %v1640_v59, %v423_v34  ;;  %v1171_v35 = vcombine.low %v439_v39, %v439_v39  ;;  %1378 = vmatprep.subr.mxu1 %v1475_v37 }
 0x110   :  { %1107 = vst [vmem:[#allocation2 + $0x1e4] sm:$0xf] %v1285_v33  ;;  %v1172_v0 = vcombine.high %v439_v39, %v439_v39  ;;  %v1188_v40 = vcombine.low %v525_v44, %v525_v44  ;;  %v1189_v63 = vcombine.high %v525_v44, %v525_v44  ;;  %v1205_v1 = vcombine.low %v611_v45, %v611_v45 }
 0x111   :  { %v1206_v2 = vcombine.high %v611_v45, %v611_v45  ;;  %v1222_v3 = vcombine.low %v697_v46, %v697_v46  ;;  %v1223_v5 = vcombine.high %v697_v46, %v697_v46  ;;  %510 = vst [vmem:[#allocation2 + $0x38] sm:$0xf] %v1171_v35  ;;  %v1239_v38 = vcombine.low %v783_v47, %v783_v47 }
 0x112   :  { %511 = vst [vmem:[#allocation2 + $0x3c] sm:$0xf] %v1172_v0  ;;  %596 = vst [vmem:[#allocation2 + $0x78] sm:$0xf] %v1188_v40  ;;  %v1240_v7 = vcombine.high %v783_v47, %v783_v47  ;;  %v1256_v8 = vcombine.low %v869_v49, %v869_v49  ;;  %v1257_v9 = vcombine.high %v869_v49, %v869_v49  ;;  %1379 = vmatpush3.xpose.msra.mxu1 %v1661_v24 }
 0x113   :  { %597 = vst [vmem:[#allocation2 + $0x7c] sm:$0xf] %v1189_v63  ;;  %682 = vst [vmem:[#allocation2 + $0xb8] sm:$0xf] %v1205_v1  ;;  %v1273_v10 = vcombine.low %v955_v60, %v955_v60  ;;  %v1274_v11 = vcombine.high %v955_v60, %v955_v60  ;;  %v1290_v12 = vcombine.low %v1041_v62, %v1041_v62  ;;  %1380 = vmatprep.subr.mxu1 %v1475_v37 }
 0x114   :  { %683 = vst [vmem:[#allocation2 + $0xbc] sm:$0xf] %v1206_v2  ;;  %768 = vst [vmem:[#allocation2 + $0xf8] sm:$0xf] %v1222_v3  ;;  %v1291_v13 = vcombine.high %v1041_v62, %v1041_v62  ;;  %v438_v16 = vmul.bf16 %v1624_v51, %v422_v4  ;;  %v524_v17 = vmul.bf16 %v1626_v52, %v422_v4 }
 0x115   :  { %769 = vst [vmem:[#allocation2 + $0xfc] sm:$0xf] %v1223_v5  ;;  %854 = vst [vmem:[#allocation2 + $0x138] sm:$0xf] %v1239_v38  ;;  %v610_v14 = vmul.bf16 %v1628_v53, %v422_v4  ;;  %v696_v18 = vmul.bf16 %v1630_v54, %v422_v4  ;;  %v782_v19 = vmul.bf16 %v1634_v56, %v422_v4 }
 0x116   :  { %855 = vst [vmem:[#allocation2 + $0x13c] sm:$0xf] %v1240_v7  ;;  %940 = vst [vmem:[#allocation2 + $0x178] sm:$0xf] %v1256_v8  ;;  %v868_v20 = vmul.bf16 %v1636_v57, %v422_v4  ;;  %v954_v21 = vmul.bf16 %v1638_v58, %v422_v4  ;;  %v1040_v22 = vmul.bf16 %v1640_v59, %v422_v4  ;;  %1381 = vmatpush3.xpose.msra.mxu1 %v1655_v6  ;;  %v181_v6 = vld [vmem:[%s1881_s2] sm:$0xff] }
 0x117   :  { %941 = vst [vmem:[#allocation2 + $0x17c] sm:$0xf] %v1257_v9  ;;  %1026 = vst [vmem:[#allocation2 + $0x1b8] sm:$0xf] %v1273_v10  ;;  %v1169_v23 = vcombine.low %v438_v16, %v438_v16  ;;  %v1170_v51 = vcombine.high %v438_v16, %v438_v16  ;;  %v1186_v26 = vcombine.low %v524_v17, %v524_v17  ;;  %1382 = vmatprep.subr.mxu1 %v1475_v37 }
 0x118   :  { %1027 = vst [vmem:[#allocation2 + $0x1bc] sm:$0xf] %v1274_v11  ;;  %1112 = vst [vmem:[#allocation2 + $0x1f8] sm:$0xf] %v1290_v12  ;;  %v1187_v52 = vcombine.high %v524_v17, %v524_v17  ;;  %v1203_v53 = vcombine.low %v610_v14, %v610_v14  ;;  %v1204_v54 = vcombine.high %v610_v14, %v610_v14 }
 0x119   :  { %1113 = vst [vmem:[#allocation2 + $0x1fc] sm:$0xf] %v1291_v13  ;;  %v1220_v28 = vcombine.low %v696_v18, %v696_v18  ;;  %v1221_v29 = vcombine.high %v696_v18, %v696_v18  ;;  %508 = vst [vmem:[#allocation2 + $0x30] sm:$0xf] %v1169_v23  ;;  %v1237_v56 = vcombine.low %v782_v19, %v782_v19 }
 0x11a   :  { %509 = vst [vmem:[#allocation2 + $0x34] sm:$0xf] %v1170_v51  ;;  %594 = vst [vmem:[#allocation2 + $0x70] sm:$0xf] %v1186_v26  ;;  %v1238_v57 = vcombine.high %v782_v19, %v782_v19  ;;  %v1254_v58 = vcombine.low %v868_v20, %v868_v20  ;;  %v1255_v59 = vcombine.high %v868_v20, %v868_v20  ;;  %1383 = vmatpush3.xpose.msra.mxu1 %v1668_v27 }
 0x11b   :  { %595 = vst [vmem:[#allocation2 + $0x74] sm:$0xf] %v1187_v52  ;;  %680 = vst [vmem:[#allocation2 + $0xb0] sm:$0xf] %v1203_v53  ;;  %v1271_v30 = vcombine.low %v954_v21, %v954_v21  ;;  %v1272_v48 = vcombine.high %v954_v21, %v954_v21  ;;  %v1288_v42 = vcombine.low %v1040_v22, %v1040_v22  ;;  %1384 = vmatprep.subr.mxu1 %v1475_v37 }
 0x11c   :  { %681 = vst [vmem:[#allocation2 + $0xb4] sm:$0xf] %v1204_v54  ;;  %766 = vst [vmem:[#allocation2 + $0xf0] sm:$0xf] %v1220_v28  ;;  %v1289_v31 = vcombine.high %v1040_v22, %v1040_v22 }
 0x11d   :  { %767 = vst [vmem:[#allocation2 + $0xf4] sm:$0xf] %v1221_v29  ;;  %852 = vst [vmem:[#allocation2 + $0x130] sm:$0xf] %v1237_v56 }
 0x11e   :  { %853 = vst [vmem:[#allocation2 + $0x134] sm:$0xf] %v1238_v57  ;;  %938 = vst [vmem:[#allocation2 + $0x170] sm:$0xf] %v1254_v58  ;;  %1385 = vmatpush3.xpose.msra.mxu1 %v1658_v15 }
 0x11f   :  { %939 = vst [vmem:[#allocation2 + $0x174] sm:$0xf] %v1255_v59  ;;  %1024 = vst [vmem:[#allocation2 + $0x1b0] sm:$0xf] %v1271_v30  ;;  %1386 = vmatprep.subr.mxu1 %v1475_v37 }
 0x120   :  { %1025 = vst [vmem:[#allocation2 + $0x1b4] sm:$0xf] %v1272_v48  ;;  %1110 = vst [vmem:[#allocation2 + $0x1f0] sm:$0xf] %v1288_v42 }
 0x121   :  { %1111 = vst [vmem:[#allocation2 + $0x1f4] sm:$0xf] %v1289_v31 }
 0x122   :  { %1387 = vmatpush3.xpose.msra.mxu1 %v1632_v55 }
 0x123   :  { %1388 = vmatprep.subr.mxu1 %v1475_v37 }
 0x126   :  { %1389 = vmatpush3.xpose.msra.mxu1 %v1609_v41 }
 0x127   :  { %1390 = vmatprep.subr.mxu1 %v1475_v37 }
 0x12a   :  { %1391 = vmatpush3.xpose.msra.mxu1 %v1644_v61 }
 0x12b   :  { %1392 = vmatprep.subr.mxu1 %v1475_v37 }
 0x12e   :  { %1393 = vmatpush3.xpose.msra.mxu1 %v1621_v50 }
 0x12f   :  { %1423 = vmatprep.subr.mxu1 %v1599_v36 }
 0x131   :  { %1395 = vmatmul.mubr.f32.vlgmr.msra.gmra.mxu1 %v181_v6 }
 0x132   :  { %1424 = vmatpush3.xpose.msra.mxu1 %v1599_v36  ;;  %1420 = vmatprep.mubr.f32.mxu1 %v1699_v25 }
 0x135   :  { %1421 = vmatmul.mubr.f32.vlgmr.msra.gmra.mxu1 %v1713_v43 }
 0x136   :  { %1442 = shalt.err (!%p1439_p4)
}
 0x137   :  { %s1478_s2 = smov 64   ;;  %s1479_s24 = smov 4   ;;  %vm399_vm6 = vcmask 64512  }
 0x138   :  { %1125 = dma.vmem_to_hbm [thread:$0]  %s1120_s1, 8192, %s1883_s4, [#allocation3], %s1478_s2, %s1478_s2, %s1479_s24  }
 0x139   :  { %s1480_s26 = smov [#allocation4]  }
 0x13a   :  { %s1132_s27 = sshll.u32 %s1480_s26, 4  ;;  %s1133_s27 = int_to_ptr.vmem [resolvable:$true] %s1132_s27 }
 0x13b   :  { %s1451_s28 = scalar_lea.vmem %s1133_s27, 128  ;;  %p1456_p6 = scmp.lt.s32.totalorder %s1133_s27, %s1133_s27 }
 0x13c   :  { %p1452_p5 = scmp.ne.s32.totalorder %s1133_s27, %s1451_s28  ;;  %p1457_p7 = scmp.lt.s32.totalorder %s1451_s28, %s1451_s28 }
 0x13e   :  { %p1458_p8 = por %p1457_p7, %p1456_p6 }
 0x140   :  { %p1459_p9 = pnand %p1458_p8, %p1452_p5 }
 0x19b   :  { %v1401_v36 = vpop.f32.mrf.mxu0 }
 0x19c   :  { %401 = vst.msk [vmem:[%s1885_s6 + $0x8] sm:$0xff] %vm399_vm6, %v1401_v36 }
 0x19d   :  { %v320_v37 = vpop.f32.mrf.mxu0 }
 0x19e   :  { %400 = vst.msk [vmem:[%s1885_s6] sm:$0xff] %vm399_vm6, %v320_v37 }
 0x19f   :  { %v1404_v41 = vpop.f32.mrf.mxu0 }
 0x1a0   :  { %403 = vst.msk [vmem:[%s1885_s6 + $0x18] sm:$0xff] %vm399_vm6, %v1404_v41 }
 0x1a1   :  { %v330_v50 = vpop.f32.mrf.mxu0 }
 0x1a2   :  { %402 = vst.msk [vmem:[%s1885_s6 + $0x10] sm:$0xff] %vm399_vm6, %v330_v50 }
 0x1a3   :  { %v1407_v55 = vpop.f32.mrf.mxu0 }
 0x1a4   :  { %405 = vst.msk [vmem:[%s1885_s6 + $0x28] sm:$0xff] %vm399_vm6, %v1407_v55 }
 0x1a5   :  { %v340_v61 = vpop.f32.mrf.mxu0 }
 0x1a6   :  { %404 = vst.msk [vmem:[%s1885_s6 + $0x20] sm:$0xff] %vm399_vm6, %v340_v61 }
 0x1a8   :  { %v1410_v15 = vpop.f32.mrf.mxu0 }
 0x1a9   :  { %407 = vst.msk [vmem:[%s1885_s6 + $0x38] sm:$0xff] %vm399_vm6, %v1410_v15 }
 0x1aa   :  { %v350_v24 = vpop.f32.mrf.mxu0 }
 0x1ab   :  { %406 = vst.msk [vmem:[%s1885_s6 + $0x30] sm:$0xff] %vm399_vm6, %v350_v24 }
 0x1ac   :  { %v1413_v27 = vpop.f32.mrf.mxu0 }
 0x1ad   :  { %409 = vst.msk [vmem:[%s1885_s6 + $0x48] sm:$0xff] %vm399_vm6, %v1413_v27 }
 0x1ae   :  { %v360_v25 = vpop.f32.mrf.mxu0 }
 0x1af   :  { %408 = vst.msk [vmem:[%s1885_s6 + $0x40] sm:$0xff] %vm399_vm6, %v360_v25 }
 0x1b0   :  { %v1416_v43 = vpop.f32.mrf.mxu0 }
 0x1b1   :  { %411 = vst.msk [vmem:[%s1885_s6 + $0x58] sm:$0xff] %vm399_vm6, %v1416_v43 }
 0x1b2   :  { %v370_v32 = vpop.f32.mrf.mxu0 }
 0x1b3   :  { %410 = vst.msk [vmem:[%s1885_s6 + $0x50] sm:$0xff] %vm399_vm6, %v370_v32 }
 0x1b4   :  { %v1419_v33 = vpop.f32.mrf.mxu0 }
 0x1b5   :  { %413 = vst.msk [vmem:[%s1885_s6 + $0x68] sm:$0xff] %vm399_vm6, %v1419_v33 }
 0x1b6   :  { %v380_v34 = vpop.f32.mrf.mxu0 }
 0x1b7   :  { %412 = vst.msk [vmem:[%s1885_s6 + $0x60] sm:$0xff] %vm399_vm6, %v380_v34 }
 0x1f1   :  { %v248_v4 = vpop.f32.mrf.mxu1 }
 0x1f2   :  { %252 = vst [vmem:[#allocation4] sm:$0xff] %v248_v4 }
 0x1f3   :  { %v1396_v39 = vpop.f32.mrf.mxu1 }
 0x1f4   :  { %1462 = shalt.err (!%p1459_p9)
}
 0x1f5   :  { %1135 = dma.vmem_to_hbm [thread:$0]  %s1133_s27, 128, %s1884_s5, [#allocation5]   ;;  %v1422_v44 = vpop.f32.mrf.mxu1 }
 0x1f6   :  { %415 = vst.msk [vmem:[%s1885_s6 + $0x78] sm:$0xff] %vm399_vm6, %v1422_v44 }
 0x1f7   :  { %v390_v45 = vpop.f32.mrf.mxu1 }
 0x1f8   :  { %414 = vst.msk [vmem:[%s1885_s6 + $0x70] sm:$0xff] %vm399_vm6, %v390_v45 }
 0x1f9   :  { %1471 = dma.done.wait [#allocation3], 8192  }
 0x1fa   :  { %1472 = vsyncadd [#allocation3], 4294959104 }
 0x1fb   :  { %1473 = dma.done.wait [#allocation5], 128  }
 0x1fc   :  { %1474 = vsyncadd [#allocation5], 4294967168 }
 0x1fd   :  { %1146 = vsyncpa [#allocation3], 1 }
 0x1fe   :  { %1147 = vsyncpa [#allocation5], 1 }

</bundles_post_ra>
